<compile_context>
chip_gen: v7x
topology: tpu7x:2x2x1
jax: 0.10.0
libtpu: 0.0.40
codegen_flags: <defaults>
</compile_context>

<pallas_src>
import functools

import jax
import jax.numpy as jnp
from jax.experimental import pallas as pl
from jax.experimental.pallas import tpu as pltpu

_LANES = 128
_TARGET_TILE_F32_BYTES = 4 << 20   # ~4 MiB of f32 work per grid step


def _sublane_multiple(dtype):
    # f32/i32 -> 8, bf16/f16 -> 16, 8-bit -> 32 (packed sublane tiling).
    itemsize = jnp.dtype(dtype).itemsize
    return max(8, 8 * (4 // itemsize))


def _xsig(e):
    # 2*e / (1 + exp(-e)) - e  ==  e * tanh(e / 2)
    return e * jnp.tanh(0.5 * e)


def _vmem_capacity_bytes():
    try:
        return int(pltpu.get_tpu_info().vmem_capacity_bytes)
    except Exception:
        return 64 << 20            # conservative default: v7x per-TC VMEM


def _num_tensorcores():
    # v7x has 2 TensorCores per chip; v5e/v6e have 1.  Deliberately
    # conservative: a wrong "1" only loses the 2x TC split, while a wrong "2"
    # would waste DMA / index math on single-TC chips.
    try:
        if "v7" in jax.devices()[0].device_kind.lower():
            return 2
    except Exception:
        pass
    return 1


def _xsigmoid_kernel(rows_valid, blocks_per_part, tile_rows, needs_mask,
                     y_ref, yp_ref, out_ref, acc_ref):
    part = pl.program_id(0)
    step = pl.program_id(1)

    @pl.when(step == 0)
    def _():
        acc_ref[...] = jnp.zeros_like(acc_ref)

    e = y_ref[...].astype(jnp.float32) - yp_ref[...].astype(jnp.float32)

    def accumulate(v):
        # (tile_rows,128) -> (tile_rows//8, 8, 128): layout-preserving split of
        # the sublane-major dim, then a pure-VPU vreg tree-add down to one
        # (8,128) vreg.  No cross-lane (XLU) work until the final step below.
        acc_ref[...] += jnp.sum(v.reshape(tile_rows // 8, 8, _LANES), axis=0)

    if needs_mask:
        # Un-clamped global row offset of this block.  Only blocks that are
        # partially past `rows_valid` (ragged last block) or entirely past it
        # (duplicated clamped block of an over-provisioned part) pay for the
        # iota+cmp+select; all other steps take the clean path.
        row0 = (part * blocks_per_part + step) * tile_rows
        boundary = row0 + tile_rows > rows_valid

        @pl.when(jnp.logical_not(boundary))
        def _():
            accumulate(_xsig(e))

        @pl.when(boundary)
        def _():
            rows = row0 + jax.lax.broadcasted_iota(jnp.int32, e.shape, 0)
            # Keep the select form: padded rows may contain garbage (NaN/Inf)
            # that a multiplicative mask would not kill.
            accumulate(_xsig(jnp.where(rows < rows_valid, e, 0.0)))
    else:
        accumulate(_xsig(e))

    @pl.when(step == pl.num_programs(1) - 1)
    def _():
        out_ref[0, 0] = jnp.sum(acc_ref[...])   # single cross-lane reduce


def xsigmoid_loss(y_t, y_prime_t):
    """Scalar XSigmoid loss; hot path runs in a Pallas TPU kernel."""
    assert y_t.shape == y_prime_t.shape
    n_elems = int(y_t.size)

    yf = jnp.ravel(y_t)
    ypf = jnp.ravel(y_prime_t)
    if yf.dtype != ypf.dtype:
        ct = jnp.promote_types(yf.dtype, ypf.dtype)
        yf, ypf = yf.astype(ct), ypf.astype(ct)

    sub = _sublane_multiple(yf.dtype)
    rows_main = (n_elems // (_LANES * sub)) * sub     # kernel-handled rows
    n_main = rows_main * _LANES

    # Tiny ragged tail (< sub*128 + 128 elements): plain JAX, negligible.
    if n_main < n_elems:
        e_tail = yf[n_main:].astype(jnp.float32) - ypf[n_main:].astype(jnp.float32)
        tail_sum = jnp.sum(_xsig(e_tail))
    else:
        tail_sum = jnp.float32(0.0)

    if rows_main == 0:
        # Degenerate tiny input: fully covered by the tail path.
        return tail_sum / jnp.float32(n_elems)

    itemsize = jnp.dtype(yf.dtype).itemsize

    # --- per-generation VMEM budget & tile sizing ------------------------
    vmem_cap = _vmem_capacity_bytes()
    vmem_limit = min((vmem_cap * 3) // 4, 96 << 20)   # explicit scoped limit
    # Per tile row: 2 inputs x 2 pipeline buffers in the input dtype, plus a
    # conservative allowance of ~8 tile-sized f32 temporaries for the
    # elementwise chain / masked branch.
    bytes_per_row = _LANES * (4 * itemsize + 8 * 4)
    max_rows = (vmem_limit - (2 << 20)) // bytes_per_row
    max_rows = min(max_rows, _TARGET_TILE_F32_BYTES // (_LANES * 4))
    max_rows = max(sub, (max_rows // sub) * sub)
    tile_rows = min(max_rows, rows_main)              # multiple of sub (>= 8)

    total_blocks = pl.cdiv(rows_main, tile_rows)
    parts = min(_num_tensorcores(), total_blocks)
    blocks_per_part = pl.cdiv(total_blocks, parts)
    over = parts * blocks_per_part != total_blocks    # duplicated clamped blocks
    ragged = total_blocks * tile_rows != rows_main    # partial last block
    needs_mask = over or ragged

    y2d = yf[:n_main].reshape(rows_main, _LANES)      # no-op when aligned
    yp2d = ypf[:n_main].reshape(rows_main, _LANES)

    if over:
        def in_map(p, i):
            # Clamp so over-provisioned parts never index past the array;
            # the duplicated blocks are masked to zero in-kernel.
            return (jnp.minimum(p * blocks_per_part + i, total_blocks - 1), 0)
    else:
        def in_map(p, i):
            return (p * blocks_per_part + i, 0)

    if parts > 1:
        # v7x: shard the leading axis across the two TensorCores.
        dims = (getattr(pltpu, "CORE_PARALLEL", "parallel"),
                getattr(pltpu, "ARBITRARY", "arbitrary"))
    else:
        dims = ("arbitrary", "arbitrary")

    kernel = functools.partial(
        _xsigmoid_kernel, rows_main, blocks_per_part, tile_rows, needs_mask)

    partials = pl.pallas_call(
        kernel,
        out_shape=jax.ShapeDtypeStruct((parts, 1), jnp.float32),
        grid_spec=pltpu.PrefetchScalarGridSpec(
            num_scalar_prefetch=0,
            grid=(parts, blocks_per_part),
            in_specs=[
                pl.BlockSpec((tile_rows, _LANES), in_map),
                pl.BlockSpec((tile_rows, _LANES), in_map),
            ],
            out_specs=pl.BlockSpec((1, 1), lambda p, i: (p, 0),
                                   memory_space=pltpu.SMEM),
            scratch_shapes=[pltpu.VMEM((8, _LANES), jnp.float32)],
        ),
        compiler_params=pltpu.CompilerParams(
            dimension_semantics=dims,
            vmem_limit_bytes=int(vmem_limit)),
    )(y2d, yp2d)

    return (jnp.sum(partials) + tail_sum) / jnp.float32(n_elems)


def xsigmoid_loss_ref(y_t, y_prime_t):
    e = y_t.astype(jnp.float32) - y_prime_t.astype(jnp.float32)
    return jnp.mean(2.0 * e / (1.0 + jnp.exp(-e)) - e)


if __name__ == "__main__":
    key = jax.random.PRNGKey(0)
    k1, k2, k3, k4, k5, k6, k7, k8 = jax.random.split(key, 8)

    # Primary example: small synthetic predictions / targets.
    shape = (2, 4, 16, 16)
    y_t = jax.random.normal(k1, shape, dtype=jnp.float32)
    y_prime_t = jax.random.normal(k2, shape, dtype=jnp.float32)
    loss = jax.block_until_ready(xsigmoid_loss(y_t, y_prime_t))
    ref = jax.block_until_ready(xsigmoid_loss_ref(y_t, y_prime_t))
    assert jnp.allclose(loss, ref, atol=1e-5, rtol=1e-5), (loss, ref)

    # Unaligned shape: exercises the plain-JAX tail.
    ya = jax.random.normal(k3, (3, 5, 7, 11), dtype=jnp.float32)
    yb = jax.random.normal(k4, (3, 5, 7, 11), dtype=jnp.float32)
    la = jax.block_until_ready(xsigmoid_loss(ya, yb))
    ra = jax.block_until_ready(xsigmoid_loss_ref(ya, yb))
    assert jnp.allclose(la, ra, atol=1e-5, rtol=1e-5), (la, ra)

    # bf16 inputs streamed in native dtype (no wrapper-side f32 copy).
    yc = jax.random.normal(k5, (64, 64, 3), dtype=jnp.bfloat16)
    yd = jax.random.normal(k6, (64, 64, 3), dtype=jnp.bfloat16)
    lc = jax.block_until_ready(xsigmoid_loss(yc, yd))
    rc = jax.block_until_ready(xsigmoid_loss_ref(yc, yd))
    assert jnp.allclose(lc, rc, atol=1e-5, rtol=1e-5), (lc, rc)

    # Multi-block input with a partial last block: exercises the predicated
    # in-kernel boundary masking plus the JAX tail.
    ye = jax.random.normal(k7, (1_200_000,), dtype=jnp.float32)
    yg = jax.random.normal(k8, (1_200_000,), dtype=jnp.float32)
    le = jax.block_until_ready(xsigmoid_loss(ye, yg))
    re = jax.block_until_ready(xsigmoid_loss_ref(ye, yg))
    assert jnp.allclose(le, re, atol=1e-5, rtol=1e-5), (le, re)

    print("KERNEL_OK")
</pallas_src>

<mosaic_0001>
module attributes {stable_mosaic.version = 11 : i64} {
  func.func @_xsigmoid_kernel(%arg0: i32, %arg1: i32, %arg2: memref<16x128xf32, #tpu.memory_space<vmem>>, %arg3: memref<16x128xf32, #tpu.memory_space<vmem>>, %arg4: memref<1x1xf32, #tpu.memory_space<smem>>, %arg5: memref<8x128xf32, #tpu.memory_space<vmem>>) attributes {dimension_semantics = [#tpu.dimension_semantics<arbitrary>, #tpu.dimension_semantics<arbitrary>], iteration_bounds = array<i64: 1, 1>, scalar_prefetch = 0 : i64, scratch_operands = 1 : i64, tpu.core_type = #tpu.core_type<tc>, window_params = [{transform_indices = @transform_0, window_bounds = array<i64: 16, 128>}, {transform_indices = @transform_1, window_bounds = array<i64: 16, 128>}, {transform_indices = @transform_2, window_bounds = array<i64: 1, 1>}]} {
    %c0_i32 = arith.constant 0 : i32
    %0 = arith.cmpi eq, %arg1, %c0_i32 : i32
    %1 = arith.extui %0 : i1 to i32
    %c0_i32_0 = arith.constant 0 : i32
    %2 = arith.cmpi ne, %1, %c0_i32_0 : i32
    scf.if %2 {
      %cst_11 = arith.constant 0.000000e+00 : f32
      %18 = vector.broadcast %cst_11 : f32 to vector<8x128xf32>
      %c0_12 = arith.constant 0 : index
      %c0_13 = arith.constant 0 : index
      %19 = vector.load %arg5[%c0_12, %c0_13] : memref<8x128xf32, #tpu.memory_space<vmem>>, vector<8x128xf32>
      tpu.vector_store %arg5[%c0_12, %c0_13], %18 {strides = array<i32>} : memref<8x128xf32, #tpu.memory_space<vmem>>, vector<8x128xf32>,
    } else {
    }
    %c0 = arith.constant 0 : index
    %c0_1 = arith.constant 0 : index
    %3 = vector.load %arg2[%c0, %c0_1] : memref<16x128xf32, #tpu.memory_space<vmem>>, vector<16x128xf32>
    %c0_2 = arith.constant 0 : index
    %c0_3 = arith.constant 0 : index
    %4 = vector.load %arg3[%c0_2, %c0_3] : memref<16x128xf32, #tpu.memory_space<vmem>>, vector<16x128xf32>
    %5 = arith.subf %3, %4 : vector<16x128xf32>
    %cst = arith.constant 5.000000e-01 : f32
    %6 = vector.broadcast %cst : f32 to vector<16x128xf32>
    %7 = arith.mulf %6, %5 : vector<16x128xf32>
    %8 = math.tanh %7 : vector<16x128xf32>
    %9 = arith.mulf %5, %8 : vector<16x128xf32>
    %c0_4 = arith.constant 0 : index
    %c0_5 = arith.constant 0 : index
    %10 = vector.load %arg5[%c0_4, %c0_5] : memref<8x128xf32, #tpu.memory_space<vmem>>, vector<8x128xf32>
    %11 = vector.shape_cast %9 : vector<16x128xf32> to vector<2x8x128xf32>
    %cst_6 = arith.constant dense<0.000000e+00> : vector<8x128xf32>
    %12 = vector.multi_reduction <add>, %11, %cst_6 [0] : vector<2x8x128xf32> to vector<8x128xf32>
    %13 = arith.addf %10, %12 : vector<8x128xf32>
    %c0_7 = arith.constant 0 : index
    %c0_8 = arith.constant 0 : index
    %14 = vector.load %arg5[%c0_7, %c0_8] : memref<8x128xf32, #tpu.memory_space<vmem>>, vector<8x128xf32>
    tpu.vector_store %arg5[%c0_7, %c0_8], %13 {strides = array<i32>} : memref<8x128xf32, #tpu.memory_space<vmem>>, vector<8x128xf32>,
    %c0_i32_9 = arith.constant 0 : i32
    %15 = arith.cmpi eq, %arg1, %c0_i32_9 : i32
    %16 = arith.extui %15 : i1 to i32
    %c0_i32_10 = arith.constant 0 : i32
    %17 = arith.cmpi ne, %16, %c0_i32_10 : i32
    scf.if %17 {
      %c0_11 = arith.constant 0 : index
      %c0_12 = arith.constant 0 : index
      %18 = vector.load %arg5[%c0_11, %c0_12] : memref<8x128xf32, #tpu.memory_space<vmem>>, vector<8x128xf32>
      %19 = vector.shape_cast %18 : vector<8x128xf32> to vector<1x8x128xf32>
      %cst_13 = arith.constant dense<0.000000e+00> : vector<1xf32>
      %20 = vector.multi_reduction <add>, %19, %cst_13 [1, 2] : vector<1x8x128xf32> to vector<1xf32>
      %21 = vector.shape_cast %20 : vector<1xf32> to vector<1x1x1xf32>
      %22 = vector.extract %21[0, 0, 0] : f32 from vector<1x1x1xf32>
      %c0_14 = arith.constant 0 : index
      %c0_15 = arith.constant 0 : index
      %23 = memref.load %arg4[%c0_14, %c0_15] : memref<1x1xf32, #tpu.memory_space<smem>>
      memref.store %22, %arg4[%c0_14, %c0_15] : memref<1x1xf32, #tpu.memory_space<smem>>
    } else {
    }
    return
  }
  func.func @transform_0(%arg0: i32, %arg1: i32) -> (i32, i32) {
    %c1_i32 = arith.constant 1 : i32
    %0 = arith.muli %arg0, %c1_i32 : i32
    %1 = arith.addi %0, %arg1 : i32
    %c0_i32 = arith.constant 0 : i32
    %c0_i32_0 = arith.constant 0 : i32
    return %1, %c0_i32 : i32, i32
  }
  func.func @transform_1(%arg0: i32, %arg1: i32) -> (i32, i32) {
    %c1_i32 = arith.constant 1 : i32
    %0 = arith.muli %arg0, %c1_i32 : i32
    %1 = arith.addi %0, %arg1 : i32
    %c0_i32 = arith.constant 0 : i32
    %c0_i32_0 = arith.constant 0 : i32
    return %1, %c0_i32 : i32, i32
  }
  func.func @transform_2(%arg0: i32, %arg1: i32) -> (i32, i32) {
    %c0_i32 = arith.constant 0 : i32
    %c0_i32_0 = arith.constant 0 : i32
    return %arg0, %c0_i32 : i32, i32
  }
}

</mosaic_0001>

<bundles_post_ra>
// kernel: tpu_custom_call.1
= control target key start
LH: loop header
LB: loop body
LE: loop exit
PB: predicated region body
PF: predicated region fallthrough
CT: control target
= control target key end

     0   :  { %7 = vsyncpa [#allocation4], 0  ;;  %s230_s0 = inlined_call_operand.hbm [shape: f32[16,128], index: 0, kind: input, shape index: {}]   ;;  %s231_s1 = inlined_call_operand.hbm [shape: f32[16,128], index: 1, kind: input, shape index: {}]   ;;  %s232_s2 = inlined_call_operand.hbm [shape: f32[1,1], index: 2, kind: output, shape index: {}]  }
   0x1   :  { %8 = vsyncpa [#allocation7], 0 }
   0x2   :  { %9 = vsyncpa [#allocation5], 0  ;;  %s174_s9 = smov [#allocation3]   ;;  %s114_s13 = scalar_lea.hbm %s230_s0, 256 }
   0x3   :  { %s19_s10 = sshll.u32 %s174_s9, 4  ;;  %p115_p0 = scmp.ne.s32.totalorder %s230_s0, %s114_s13  ;;  %s20_s10 = int_to_ptr.vmem [resolvable:$true] %s19_s10 }
   0x4   :  { %p118_p1 = scmp.lt.u32.totalorder %s114_s13, %s230_s0 }
   0x6   :  { %p120_p2 = pnand %p118_p1, %p115_p0 }
   0x8   :  { %123 = shalt.err (!%p120_p2)
}
   0x9   :  { %s124_s18 = scalar_lea.vmem %s20_s10, 256  ;;  %p129_p4 = scmp.lt.s32.totalorder %s20_s10, %s20_s10 }
   0xa   :  { %p125_p3 = scmp.ne.s32.totalorder %s20_s10, %s124_s18  ;;  %p130_p5 = scmp.lt.s32.totalorder %s124_s18, %s124_s18 }
   0xc   :  { %p131_p6 = por %p130_p5, %p129_p4 }
   0xe   :  { %p132_p7 = pnand %p131_p6, %p125_p3 }
  0x10   :  { %135 = shalt.err (!%p132_p7)
}
  0x11   :  { %s175_s19 = smov 128   ;;  %s176_s20 = smov 8  }
  0x12   :  { %25 = dma.hbm_to_vmem [thread:$0]  %s230_s0, 256, %s20_s10, [#allocation4], %s175_s19, %s175_s19, %s176_s20  }
  0x13   :  { %s177_s23 = smov [#allocation6]   ;;  %s136_s27 = scalar_lea.hbm %s231_s1, 256 }
  0x14   :  { %s35_s24 = sshll.u32 %s177_s23, 4  ;;  %p137_p8 = scmp.ne.s32.totalorder %s231_s1, %s136_s27  ;;  %s36_s24 = int_to_ptr.vmem [resolvable:$true] %s35_s24 }
  0x15   :  { %p140_p9 = scmp.lt.u32.totalorder %s136_s27, %s231_s1 }
  0x17   :  { %p142_p10 = pnand %p140_p9, %p137_p8 }
  0x19   :  { %145 = shalt.err (!%p142_p10)
}
  0x1a   :  { %s146_s4 = scalar_lea.vmem %s36_s24, 256  ;;  %p151_p12 = scmp.lt.s32.totalorder %s36_s24, %s36_s24 }
  0x1b   :  { %p147_p11 = scmp.ne.s32.totalorder %s36_s24, %s146_s4  ;;  %p152_p13 = scmp.lt.s32.totalorder %s146_s4, %s146_s4 }
  0x1d   :  { %p153_p0 = por %p152_p13, %p151_p12 }
  0x1f   :  { %p154_p1 = pnand %p153_p0, %p147_p11 }
  0x21   :  { %157 = shalt.err (!%p154_p1)
}
  0x22   :  { %41 = dma.hbm_to_vmem [thread:$0]  %s231_s1, 256, %s36_s24, [#allocation7], %s175_s19, %s175_s19, %s176_s20  }
  0x23   :  { %168 = dma.done.wait [#allocation4], 256  }
  0x24   :  { %169 = vsyncadd [#allocation4], 4294967040 }
  0x25   :  { %170 = dma.done.wait [#allocation7], 256  }
  0x26   :  { %171 = vsyncadd [#allocation7], 4294967040  ;;  %v57_v0 = vld [vmem:[#allocation3] sm:$0xff]  ;;  %v58_v1 = vld [vmem:[#allocation3 + $0x8] sm:$0xff]  ;;  %s158_s8 = scalar_lea.hbm %s232_s2, 16 }
  0x27   :  { %v59_v2 = vld [vmem:[#allocation6] sm:$0xff]  ;;  %v60_v3 = vld [vmem:[#allocation6 + $0x8] sm:$0xff]  ;;  %p159_p2 = scmp.ne.s32.totalorder %s232_s2, %s158_s8  ;;  %p162_p3 = scmp.lt.u32.totalorder %s158_s8, %s232_s2 }
  0x28   :  { %v61_v4 = vsub.f32 %v57_v0, %v59_v2  ;;  %v62_v5 = vsub.f32 %v58_v1, %v60_v3 }
  0x29   :  { %p164_p4 = pnand %p162_p3, %p159_p2 }
  0x2a   :  { %v63_v6 = vmul.f32 0.5, %v61_v4  ;;  %v64_v7 = vmul.f32 0.5, %v62_v5 }
  0x2c   :  { %110 = vtanh.f32 %v63_v6 }
  0x2d   :  { %112 = vtanh.f32 %v64_v7 }
  0x36   :  { %v111_v8 = vpop.eup %110 }
  0x37   :  { %v113_v9 = vpop.eup %112  ;;  %v67_v10 = vmul.f32 %v111_v8, %v61_v4 }
  0x38   :  { %v68_v11 = vmul.f32 %v113_v9, %v62_v5 }
  0x3a   :  { %v70_v12 = vadd.f32 %v68_v11, %v67_v10 }
  0x3c   :  { %77 = vadd.xlane.f32.xlu0 %v70_v12 }
  0xc9   :  { %v78_v13 = vpop.xlane.xlu0 %77 }
  0xca   :  { %v79_v14 = vrot.slane %v78_v13, 4 }
  0xcc   :  { %v80_v15 = vadd.f32 %v79_v14, %v78_v13 }
  0xce   :  { %v81_v16 = vrot.slane %v80_v15, 2 }
  0xd0   :  { %v82_v17 = vadd.f32 %v81_v16, %v80_v15 }
  0xd2   :  { %v83_v18 = vrot.slane %v82_v17, 1 }
  0xd4   :  { %v84_v19 = vadd.f32 %v83_v18, %v82_v17 }
  0xd6   :  { %103 = vpush %v84_v19 }
 0x107   :  { %s104_s1 = spop %103 }
 0x108   :  { %87 = sst [smem:[#allocation8]] %s104_s1 }
 0x109   :  { %167 = shalt.err (!%p164_p4)
}
 0x10a   :  { %s178_s13 = smov [#allocation8]  }
 0x10b   :  { %95 = dma.smem_to_hbm %s178_s13, 16, %s232_s2, [#allocation5]  }
 0x10c   :  { %172 = dma.done.wait [#allocation5], 16  }
 0x10d   :  { %173 = vsyncadd [#allocation5], 4294967280 }
 0x10e   :  { %99 = sfence }
 0x10f   :  { %100 = vsyncpa [#allocation4], 1 }
 0x110   :  { %101 = vsyncpa [#allocation7], 1 }
 0x111   :  { %102 = vsyncpa [#allocation5], 1 }

</bundles_post_ra>
